<compile_context>
chip_gen: v7x
topology: tpu7x:2x2x1
jax: 0.10.0
libtpu: 0.0.40
codegen_flags: <defaults>
</compile_context>

<pallas_src>
import functools

import jax
import jax.numpy as jnp
import numpy as np
from jax.experimental import pallas as pl
from jax.experimental.pallas import tpu as pltpu

MAX_LENGTH = 47  # module constant (mask width = max_length + 3); only feeds self-attention


def _round_up(x, m):
    return ((x + m - 1) // m) * m


def _pick_row_tile(m):
    # m is always a multiple of 8 (B_pad is). Use the whole thing when small.
    if m <= 512:
        return m
    return 256


def _pick_time_chunk(t, b_pad, g_pad):
    # keep each GI chunk (Tc, B_pad, 3H_pad) f32 around <= 2 MiB so the
    # double-buffered pipeline fits comfortably in VMEM (64 MiB on v7x).
    budget = 2 * 1024 * 1024
    bytes_per_t = b_pad * g_pad * 4
    return max(1, min(t, budget // max(1, bytes_per_t)))


# ---------------------------------------------------------------------------
# Kernel 1: hoisted input projection  GI = X @ W_ih^T + (b_ih [+ b_hh r/z])
# Parallel over row tiles of the flattened (T*B, in_dim) input.
# ---------------------------------------------------------------------------
def _input_proj_kernel(x_ref, w_ref, b_ref, gi_ref):
    x = x_ref[...].astype(jnp.bfloat16)
    gi = jnp.dot(x, w_ref[...], preferred_element_type=jnp.float32)
    gi_ref[...] = gi + b_ref[...]


def input_proj_pallas(x_flat, w_t_bf16, bias_row, *, tm):
    m, k = x_flat.shape
    g = w_t_bf16.shape[1]
    return pl.pallas_call(
        _input_proj_kernel,
        out_shape=jax.ShapeDtypeStruct((m, g), jnp.float32),
        grid_spec=pltpu.PrefetchScalarGridSpec(
            num_scalar_prefetch=0,
            grid=(m // tm,),
            in_specs=[
                pl.BlockSpec((tm, k), lambda i: (i, 0)),
                pl.BlockSpec((k, g), lambda i: (0, 0)),
                pl.BlockSpec((1, g), lambda i: (0, 0)),
            ],
            out_specs=pl.BlockSpec((tm, g), lambda i: (i, 0)),
        ),
        compiler_params=pltpu.CompilerParams(
            dimension_semantics=("parallel",),
            vmem_limit_bytes=64 * 1024 * 1024),
    )(x_flat, w_t_bf16, bias_row)


# ---------------------------------------------------------------------------
# Kernel 2a: GRU recurrence, final layer — gather hidden at lengths-1 + l2norm.
# grid = (num_time_chunks,) sequential; fori_loop over the chunk inside.
# ---------------------------------------------------------------------------
def _gru_feat_kernel(lenm1_ref, gi_ref, whh_ref, bhn_ref, feat_ref, h_scr,
                     *, hidden, chunk):
    H = hidden
    Tc = chunk
    c = pl.program_id(0)
    n_chunks = pl.num_programs(0)

    @pl.when(c == 0)
    def _():
        h_scr[...] = jnp.zeros_like(h_scr)
        feat_ref[...] = jnp.zeros_like(feat_ref)

    lenm1 = lenm1_ref[...]          # (B, 1) int32, loaded once per chunk
    bhn = bhn_ref[...]              # (1, H) f32 (b_hn only; b_ih/b_hr/b_hz folded into GI)
    t0 = c * Tc

    def step(i, carry):
        h, feat = carry
        gi = gi_ref[i]              # (B, 3H) f32, dynamic index along time
        gh = jnp.dot(h.astype(jnp.bfloat16), whh_ref[...],
                     preferred_element_type=jnp.float32)
        r = jax.nn.sigmoid(gi[:, 0:H] + gh[:, 0:H])
        z = jax.nn.sigmoid(gi[:, H:2 * H] + gh[:, H:2 * H])
        n = jnp.tanh(gi[:, 2 * H:3 * H] + r * (gh[:, 2 * H:3 * H] + bhn))
        h_new = (1.0 - z) * n + z * h
        # pack_padded_sequence + gather(lengths-1) equivalent: keep h at the
        # last valid timestep of each row (padded steps are never selected).
        feat = jnp.where(lenm1 == (t0 + i), h_new, feat)
        return h_new, feat

    h_fin, feat = jax.lax.fori_loop(0, Tc, step, (h_scr[...], feat_ref[...]))
    h_scr[...] = h_fin
    feat_ref[...] = feat

    @pl.when(c == n_chunks - 1)
    def _():
        # l2norm(X, dim=-1): X / (sqrt(sum(X^2, -1)) + 1e-8)
        f = feat_ref[...]
        norm = jnp.sqrt(jnp.sum(f * f, axis=-1, keepdims=True)) + 1e-8
        feat_ref[...] = f / norm


def gru_feat_layer_pallas(gi_tbg, lenm1_2d, whh_t_bf16, bhn_row, *, hidden, chunk):
    T_pad, B, G = gi_tbg.shape
    H = hidden
    return pl.pallas_call(
        functools.partial(_gru_feat_kernel, hidden=H, chunk=chunk),
        out_shape=jax.ShapeDtypeStruct((B, H), jnp.float32),
        grid_spec=pltpu.PrefetchScalarGridSpec(
            num_scalar_prefetch=0,
            grid=(T_pad // chunk,),
            in_specs=[
                pl.BlockSpec((B, 1), lambda c: (0, 0)),        # lengths - 1
                pl.BlockSpec((chunk, B, G), lambda c: (c, 0, 0)),  # GI chunk
                pl.BlockSpec((H, G), lambda c: (0, 0)),        # W_hh^T (bf16)
                pl.BlockSpec((1, H), lambda c: (0, 0)),        # b_hn
            ],
            out_specs=pl.BlockSpec((B, H), lambda c: (0, 0)),  # resident accumulator
            scratch_shapes=[pltpu.VMEM((B, H), jnp.float32)],  # carried hidden state
        ),
        compiler_params=pltpu.CompilerParams(
            dimension_semantics=("arbitrary",),
            vmem_limit_bytes=64 * 1024 * 1024),
    )(lenm1_2d, gi_tbg, whh_t_bf16, bhn_row)


# ---------------------------------------------------------------------------
# Kernel 2b: GRU recurrence, intermediate layer — emits the hidden sequence
# (only used when num_layers > 1), written back in lane-dense time chunks.
# ---------------------------------------------------------------------------
def _gru_seq_kernel(gi_ref, whh_ref, bhn_ref, seq_ref, h_scr, *, hidden, chunk):
    H = hidden
    Tc = chunk
    c = pl.program_id(0)

    @pl.when(c == 0)
    def _():
        h_scr[...] = jnp.zeros_like(h_scr)

    bhn = bhn_ref[...]

    def step(i, h):
        gi = gi_ref[i]
        gh = jnp.dot(h.astype(jnp.bfloat16), whh_ref[...],
                     preferred_element_type=jnp.float32)
        r = jax.nn.sigmoid(gi[:, 0:H] + gh[:, 0:H])
        z = jax.nn.sigmoid(gi[:, H:2 * H] + gh[:, H:2 * H])
        n = jnp.tanh(gi[:, 2 * H:3 * H] + r * (gh[:, 2 * H:3 * H] + bhn))
        h_new = (1.0 - z) * n + z * h
        seq_ref[i] = h_new
        return h_new

    h_scr[...] = jax.lax.fori_loop(0, Tc, step, h_scr[...])


def gru_seq_layer_pallas(gi_tbg, whh_t_bf16, bhn_row, *, hidden, chunk):
    T_pad, B, G = gi_tbg.shape
    H = hidden
    return pl.pallas_call(
        functools.partial(_gru_seq_kernel, hidden=H, chunk=chunk),
        out_shape=jax.ShapeDtypeStruct((T_pad, B, H), jnp.float32),
        grid_spec=pltpu.PrefetchScalarGridSpec(
            num_scalar_prefetch=0,
            grid=(T_pad // chunk,),
            in_specs=[
                pl.BlockSpec((chunk, B, G), lambda c: (c, 0, 0)),
                pl.BlockSpec((H, G), lambda c: (0, 0)),
                pl.BlockSpec((1, H), lambda c: (0, 0)),
            ],
            out_specs=pl.BlockSpec((chunk, B, H), lambda c: (c, 0, 0)),
            scratch_shapes=[pltpu.VMEM((B, H), jnp.float32)],
        ),
        compiler_params=pltpu.CompilerParams(
            dimension_semantics=("arbitrary",),
            vmem_limit_bytes=64 * 1024 * 1024),
    )(gi_tbg, whh_t_bf16, bhn_row)


# ---------------------------------------------------------------------------
# Parameter padding helpers (gate blocks [r|z|n] placed at H_pad boundaries).
# ---------------------------------------------------------------------------
def _pad_gate_matrix(w_t, rows_pad, h, h_pad):
    in_dim = w_t.shape[0]
    out = jnp.zeros((rows_pad, 3 * h_pad), jnp.float32)
    for g in range(3):
        out = out.at[:in_dim, g * h_pad:g * h_pad + h].set(w_t[:, g * h:(g + 1) * h])
    return out


def _pad_gate_vector(b, h, h_pad):
    out = jnp.zeros((1, 3 * h_pad), jnp.float32)
    for g in range(3):
        out = out.at[0, g * h_pad:g * h_pad + h].set(b[g * h:(g + 1) * h])
    return out


class EncoderTextPallas:
    """JAX/Pallas port of EncoderText (bi_gru=False, self_attention=False)."""

    def __init__(self, vocab_size, word_dim, embed_size, num_layers, key):
        self.embed_size = embed_size
        self.num_layers = num_layers
        self.word_dim = word_dim
        H = embed_size
        self.h_pad = _round_up(H, 128)

        keys = jax.random.split(key, num_layers + 1)
        # nn.Embedding weight ~ U(-0.1, 0.1) as in _init_weights
        self.embed = jax.random.uniform(
            keys[0], (vocab_size, word_dim), jnp.float32, -0.1, 0.1)

        # nn.GRU default init: U(-1/sqrt(H), 1/sqrt(H)); keep raw f32 params for
        # the reference, precompute padded/bf16 kernel params separately.
        bound = 1.0 / float(np.sqrt(H))
        self.layers = []
        for l in range(num_layers):
            in_dim = word_dim if l == 0 else H
            k1, k2, k3, k4 = jax.random.split(keys[l + 1], 4)
            w_ih = jax.random.uniform(k1, (3 * H, in_dim), jnp.float32, -bound, bound)
            w_hh = jax.random.uniform(k2, (3 * H, H), jnp.float32, -bound, bound)
            b_ih = jax.random.uniform(k3, (3 * H,), jnp.float32, -bound, bound)
            b_hh = jax.random.uniform(k4, (3 * H,), jnp.float32, -bound, bound)
            self.layers.append((w_ih, w_hh, b_ih, b_hh))

        self.kernel_layers = []
        for l, (w_ih, w_hh, b_ih, b_hh) in enumerate(self.layers):
            in_dim = w_ih.shape[1]
            rows_pad = in_dim if l == 0 else self.h_pad
            wih_t = _pad_gate_matrix(w_ih.T, rows_pad, H, self.h_pad)
            whh_t = _pad_gate_matrix(w_hh.T, self.h_pad, H, self.h_pad)
            # Fold b_ih plus the r/z parts of b_hh into the GI bias; keep b_hn
            # separately (it sits inside the r * (...) term of the n gate).
            gi_bias = b_ih.at[:2 * H].add(b_hh[:2 * H])
            gi_bias_pad = _pad_gate_vector(gi_bias, H, self.h_pad)
            bhn_pad = jnp.zeros((1, self.h_pad), jnp.float32).at[0, :H].set(b_hh[2 * H:])
            self.kernel_layers.append((wih_t.astype(jnp.bfloat16),
                                       whh_t.astype(jnp.bfloat16),
                                       gi_bias_pad, bhn_pad))

    def __call__(self, x, lengths):
        # x: (B, T) int32 token ids, lengths: (B,) int32 (>= 1, as pack_padded requires)
        B, T = x.shape
        H, H_pad = self.embed_size, self.h_pad
        G_pad = 3 * H_pad
        B_pad = _round_up(B, 8)

        Tc = _pick_time_chunk(T, B_pad, G_pad)
        T_pad = _round_up(T, Tc)

        # Embedding gather directly into time-major (T, B, D): transpose the
        # small int token matrix instead of the float activations.
        emb_tbd = self.embed[x.T]
        emb_tbd = jnp.pad(emb_tbd, ((0, T_pad - T), (0, B_pad - B), (0, 0)))

        lenm1 = jnp.full((B_pad, 1), -1, jnp.int32)
        lenm1 = lenm1.at[:B, 0].set(lengths.astype(jnp.int32) - 1)

        x_in = emb_tbd
        feat = None
        for l, (wih_t, whh_t, gi_bias, bhn) in enumerate(self.kernel_layers):
            in_dim = x_in.shape[-1]
            M = T_pad * B_pad
            x_flat = x_in.reshape(M, in_dim)
            tm = _pick_row_tile(M)
            M_pad = _round_up(M, tm)
            if M_pad != M:
                x_flat = jnp.pad(x_flat, ((0, M_pad - M), (0, 0)))
            gi_flat = input_proj_pallas(x_flat, wih_t, gi_bias, tm=tm)
            gi = gi_flat[:M].reshape(T_pad, B_pad, G_pad)
            if l < self.num_layers - 1:
                x_in = gru_seq_layer_pallas(gi, whh_t, bhn, hidden=H_pad, chunk=Tc)
            else:
                feat = gru_feat_layer_pallas(gi, lenm1, whh_t, bhn,
                                             hidden=H_pad, chunk=Tc)
        return feat[:B, :H]                      # (B, embed_size), l2-normalized


def _reference_forward(enc, x, lengths):
    """Pure-JAX f32 reference (lax.scan GRU) for sanity-checking the kernels."""
    emb = enc.embed[x]                            # (B, T, D)
    h_seq = jnp.transpose(emb, (1, 0, 2))         # (T, B, D)
    H = enc.embed_size
    for (w_ih, w_hh, b_ih, b_hh) in enc.layers:
        wih_t, whh_t = w_ih.T, w_hh.T

        def step(h, x_t, wih_t=wih_t, whh_t=whh_t, b_ih=b_ih, b_hh=b_hh):
            gi = x_t @ wih_t + b_ih
            gh = h @ whh_t + b_hh
            r = jax.nn.sigmoid(gi[:, :H] + gh[:, :H])
            z = jax.nn.sigmoid(gi[:, H:2 * H] + gh[:, H:2 * H])
            n = jnp.tanh(gi[:, 2 * H:] + r * gh[:, 2 * H:])
            h_new = (1.0 - z) * n + z * h
            return h_new, h_new

        h0 = jnp.zeros((h_seq.shape[1], H), jnp.float32)
        _, h_seq = jax.lax.scan(step, h0, h_seq)  # (T, B, H)
    out = jnp.transpose(h_seq, (1, 0, 2))         # (B, T, H)
    idx = (lengths - 1).astype(jnp.int32)
    gathered = out[jnp.arange(out.shape[0]), idx]  # (B, H)
    norm = jnp.sqrt(jnp.sum(gathered * gathered, axis=-1, keepdims=True)) + 1e-8
    return gathered / norm


if __name__ == "__main__":
    key = jax.random.PRNGKey(0)
    k_params, k_tokens = jax.random.split(key)

    vocab_size, word_dim, embed_size, num_layers = 50, 32, 32, 1
    B, T = 2, 8

    enc = EncoderTextPallas(vocab_size, word_dim, embed_size, num_layers, k_params)

    x = jax.random.randint(k_tokens, (B, T), 0, vocab_size, dtype=jnp.int32)
    lengths = jnp.array([8, 5], dtype=jnp.int32)  # descending, as pack_padded requires

    out = jax.block_until_ready(enc(x, lengths))
    ref = jax.block_until_ready(_reference_forward(enc, x, lengths))

    np.testing.assert_allclose(np.asarray(out), np.asarray(ref), rtol=5e-2, atol=5e-2)
    assert out.shape == (B, embed_size)

    print("KERNEL_OK")
</pallas_src>

<mosaic_0001>
module attributes {stable_mosaic.version = 11 : i64} {
  func.func @_input_proj_kernel(%arg0: i32, %arg1: memref<64x32xf32, #tpu.memory_space<vmem>>, %arg2: memref<32x384xbf16, #tpu.memory_space<vmem>>, %arg3: memref<1x384xf32, #tpu.memory_space<vmem>>, %arg4: memref<64x384xf32, #tpu.memory_space<vmem>>) attributes {dimension_semantics = [#tpu.dimension_semantics<parallel>], iteration_bounds = array<i64: 1>, scalar_prefetch = 0 : i64, scratch_operands = 0 : i64, tpu.core_type = #tpu.core_type<tc>, window_params = [{transform_indices = @transform_0, window_bounds = array<i64: 64, 32>}, {pipeline_mode = #tpu.pipeline_mode<synchronous>, transform_indices = @transform_1, window_bounds = array<i64: 32, 384>}, {pipeline_mode = #tpu.pipeline_mode<synchronous>, transform_indices = @transform_2, window_bounds = array<i64: 1, 384>}, {transform_indices = @transform_3, window_bounds = array<i64: 64, 384>}]} {
    %c0 = arith.constant 0 : index
    %c0_0 = arith.constant 0 : index
    %0 = vector.load %arg1[%c0, %c0_0] : memref<64x32xf32, #tpu.memory_space<vmem>>, vector<64x32xf32>
    %1 = arith.truncf %0 : vector<64x32xf32> to vector<64x32xbf16>
    %c0_1 = arith.constant 0 : index
    %c0_2 = arith.constant 0 : index
    %2 = vector.load %arg2[%c0_1, %c0_2] : memref<32x384xbf16, #tpu.memory_space<vmem>>, vector<32x384xbf16>
    %cst = arith.constant dense<0.000000e+00> : vector<64x384xf32>
    %3 = tpu.matmul %1, %2, %cst {dimension_numbers = #tpu.dot_dimension_numbers<[1], [0], [0], [1], [0, 0, 1, 1], [], []>} : vector<64x32xbf16>, vector<32x384xbf16>, vector<64x384xf32> -> vector<64x384xf32>
    %c0_3 = arith.constant 0 : index
    %c0_4 = arith.constant 0 : index
    %4 = vector.load %arg3[%c0_3, %c0_4] : memref<1x384xf32, #tpu.memory_space<vmem>>, vector<1x384xf32>
    %5 = vector.broadcast %4 : vector<1x384xf32> to vector<64x384xf32>
    %6 = arith.addf %3, %5 : vector<64x384xf32>
    %c0_5 = arith.constant 0 : index
    %c0_6 = arith.constant 0 : index
    %7 = vector.load %arg4[%c0_5, %c0_6] : memref<64x384xf32, #tpu.memory_space<vmem>>, vector<64x384xf32>
    tpu.vector_store %arg4[%c0_5, %c0_6], %6 {strides = array<i32>} : memref<64x384xf32, #tpu.memory_space<vmem>>, vector<64x384xf32>,
    return
  }
  func.func @transform_0(%arg0: i32) -> (i32, i32) {
    %c0_i32 = arith.constant 0 : i32
    %c0_i32_0 = arith.constant 0 : i32
    return %arg0, %c0_i32 : i32, i32
  }
  func.func @transform_1(%arg0: i32) -> (i32, i32) {
    %c0_i32 = arith.constant 0 : i32
    %c0_i32_0 = arith.constant 0 : i32
    %c0_i32_1 = arith.constant 0 : i32
    return %c0_i32, %c0_i32_0 : i32, i32
  }
  func.func @transform_2(%arg0: i32) -> (i32, i32) {
    %c0_i32 = arith.constant 0 : i32
    %c0_i32_0 = arith.constant 0 : i32
    %c0_i32_1 = arith.constant 0 : i32
    return %c0_i32, %c0_i32_0 : i32, i32
  }
  func.func @transform_3(%arg0: i32) -> (i32, i32) {
    %c0_i32 = arith.constant 0 : i32
    %c0_i32_0 = arith.constant 0 : i32
    return %arg0, %c0_i32 : i32, i32
  }
}

</mosaic_0001>

<bundles_post_ra>
// kernel: tpu_custom_call.1
= control target key start
LH: loop header
LB: loop body
LE: loop exit
PB: predicated region body
PF: predicated region fallthrough
CT: control target
= control target key end

     0   :  { %8 = vsyncpa [#allocation3], 0  ;;  %s573_s0 = inlined_call_operand.hbm [shape: f32[64,32], index: 0, kind: input, shape index: {}]   ;;  %s574_s1 = inlined_call_operand.hbm [shape: bf16[32,384], index: 1, kind: input, shape index: {}]   ;;  %s575_s2 = inlined_call_operand.hbm [shape: f32[1,384], index: 2, kind: input, shape index: {}]   ;;  %s576_s3 = inlined_call_operand.hbm [shape: f32[64,384], index: 3, kind: output, shape index: {}]  }
   0x1   :  { %9 = vsyncpa [#allocation6], 0 }
   0x2   :  { %10 = vsyncpa [#allocation4], 0  ;;  %s466_s12 = smov [#allocation5]   ;;  %s372_s16 = scalar_lea.hbm %s574_s1, 768 }
   0x3   :  { %s28_s13 = sshll.u32 %s466_s12, 4  ;;  %p373_p0 = scmp.ne.s32.totalorder %s574_s1, %s372_s16  ;;  %s29_s13 = int_to_ptr.vmem [resolvable:$true] %s28_s13 }
   0x4   :  { %p376_p1 = scmp.lt.u32.totalorder %s372_s16, %s574_s1 }
   0x6   :  { %p378_p2 = pnand %p376_p1, %p373_p0 }
   0x8   :  { %381 = shalt.err (!%p378_p2)
}
   0x9   :  { %s382_s21 = scalar_lea.vmem %s29_s13, 768  ;;  %p387_p4 = scmp.lt.s32.totalorder %s29_s13, %s29_s13 }
   0xa   :  { %p383_p3 = scmp.ne.s32.totalorder %s29_s13, %s382_s21  ;;  %p388_p5 = scmp.lt.s32.totalorder %s382_s21, %s382_s21 }
   0xc   :  { %p389_p6 = por %p388_p5, %p387_p4 }
   0xe   :  { %p390_p7 = pnand %p389_p6, %p383_p3 }
  0x10   :  { %393 = shalt.err (!%p390_p7)
}
  0x11   :  { %s467_s22 = smov 192   ;;  %s468_s23 = smov 12  }
  0x12   :  { %34 = dma.hbm_to_vmem [thread:$0]  %s574_s1, 768, %s29_s13, [#allocation6], %s467_s22, %s467_s22, %s468_s23  }
  0x13   :  { %s469_s26 = smov [#allocation2]   ;;  %s394_s30 = scalar_lea.hbm %s573_s0, 1024 }
  0x14   :  { %s16_s27 = sshll.u32 %s469_s26, 4  ;;  %p395_p8 = scmp.ne.s32.totalorder %s573_s0, %s394_s30  ;;  %s17_s27 = int_to_ptr.vmem [resolvable:$true] %s16_s27 }
  0x15   :  { %p398_p9 = scmp.lt.u32.totalorder %s394_s30, %s573_s0 }
  0x17   :  { %p400_p10 = pnand %p398_p9, %p395_p8 }
  0x19   :  { %403 = shalt.err (!%p400_p10)
}
  0x1a   :  { %s404_s8 = scalar_lea.vmem %s17_s27, 1024  ;;  %p409_p12 = scmp.lt.s32.totalorder %s17_s27, %s17_s27 }
  0x1b   :  { %p405_p11 = scmp.ne.s32.totalorder %s17_s27, %s404_s8  ;;  %p410_p13 = scmp.lt.s32.totalorder %s404_s8, %s404_s8 }
  0x1d   :  { %p411_p0 = por %p410_p13, %p409_p12 }
  0x1f   :  { %p412_p1 = pnand %p411_p0, %p405_p11 }
  0x21   :  { %415 = shalt.err (!%p412_p1)
}
  0x22   :  { %s470_s1 = smov 128   ;;  %s471_s9 = smov 8  }
  0x23   :  { %22 = dma.hbm_to_vmem [thread:$0]  %s573_s0, 1024, %s17_s27, [#allocation3], %s470_s1, %s470_s1, %s471_s9  }
  0x24   :  { %s472_s12 = smov [#allocation7]   ;;  %s416_s16 = scalar_lea.hbm %s575_s2, 48 }
  0x25   :  { %s41_s13 = sshll.u32 %s472_s12, 4  ;;  %p417_p2 = scmp.ne.s32.totalorder %s575_s2, %s416_s16  ;;  %s42_s13 = int_to_ptr.vmem [resolvable:$true] %s41_s13 }
  0x26   :  { %p420_p3 = scmp.lt.u32.totalorder %s416_s16, %s575_s2 }
  0x28   :  { %p422_p4 = pnand %p420_p3, %p417_p2 }
  0x2a   :  { %425 = shalt.err (!%p422_p4)
}
  0x2b   :  { %s426_s21 = scalar_lea.vmem %s42_s13, 48  ;;  %s430_s0 = scalar_lea.vmem %s42_s13, 64 }
  0x2c   :  { %p427_p5 = scmp.ne.s32.totalorder %s42_s13, %s426_s21  ;;  %p431_p6 = scmp.lt.s32.totalorder %s42_s13, %s42_s13 }
  0x2d   :  { %p432_p7 = scmp.lt.s32.totalorder %s430_s0, %s426_s21 }
  0x2f   :  { %p433_p8 = por %p432_p7, %p431_p6 }
  0x31   :  { %p434_p9 = pnand %p433_p8, %p427_p5 }
  0x33   :  { %437 = shalt.err (!%p434_p9)
}
  0x34   :  { %44 = dma.hbm_to_vmem [thread:$0]  %s575_s2, 48, %s42_s13, [#allocation6]  }
  0x35   :  { %460 = dma.done.wait [#allocation3], 1024  }
  0x36   :  { %461 = vsyncadd [#allocation3], 4294966272 }
  0x37   :  { %462 = dma.done.wait [#allocation6], 816  }
  0x38   :  { %463 = vsyncadd [#allocation6], 4294966480  ;;  %v473_v0 = vmov 0   ;;  %v364_v1 = vld [vmem:[#allocation5 + $0x4] ss:$12 sps:$4 sm:$0xff]   ;;  %v56_v6 = vld [vmem:[#allocation2 + $0x8] sm:$0xff]  ;;  %v77_v19 = vlaneseq }
  0x39   :  { %169 = vmatprep.mubr.bf16.mxu0 %v473_v0  ;;  %199 = vmatprep.mubr.bf16.mxu1 %v473_v0  ;;  %v366_v2 = vld [vmem:[#allocation5] ss:$12 sps:$4 sm:$0xff]   ;;  %v367_v3 = vld [vmem:[#allocation5 + $0x1c] ss:$12 sps:$4 sm:$0xff]   ;;  %v369_v4 = vld [vmem:[#allocation5 + $0x18] ss:$12 sps:$4 sm:$0xff]  }
  0x3a   :  { %137 = vmatprep.subr.bf16.mxu0 %v364_v1  ;;  %349 = vmatprep.subr.bf16.mxu1 %v364_v1  ;;  %v55_v5 = vld [vmem:[#allocation2] sm:$0xff]  ;;  %v61_v7 = vld [vmem:[#allocation2 + $0x30] sm:$0xff]  ;;  %v62_v8 = vld [vmem:[#allocation2 + $0x38] sm:$0xff]  ;;  %vm124_vm0 = vcmask 261120   ;;  %v78_v20 = vshrl.u32 %v77_v19, 7  ;;  %s474_s2 = smov [#allocation8]  }
  0x3b   :  { %138 = vmatpush1.bf16.msra.mxu0 %v366_v2  ;;  %351 = vmatpush1.bf16.msra.mxu1 %v366_v2  ;;  %v370_v9 = vld [vmem:[#allocation5 + $0x8] ss:$12 sps:$4 sm:$0xff]   ;;  %v63_v10 = vpack.c.bf16 %v56_v6, %v55_v5  ;;  %v66_v11 = vpack.c.bf16 %v62_v8, %v61_v7  ;;  %v371_v12 = vld [vmem:[#allocation5 + $0x20] ss:$12 sps:$4 sm:$0xff]   ;;  %v58_v14 = vld [vmem:[#allocation2 + $0x18] sm:$0xff]  ;;  %s304_s24 = sshll.u32 %s474_s2, 4  ;;  %s305_s24 = int_to_ptr.vmem [resolvable:$true] %s304_s24 }
  0x3c   :  { %139 = vmatprep.subr.bf16.mxu0 %v367_v3  ;;  %350 = vmatprep.subr.bf16.mxu1 %v367_v3  ;;  %v57_v13 = vld [vmem:[#allocation2 + $0x10] sm:$0xff]  ;;  %v59_v15 = vld [vmem:[#allocation2 + $0x20] sm:$0xff]  ;;  %v60_v16 = vld [vmem:[#allocation2 + $0x28] sm:$0xff]  ;;  %v79_v21 = vsub.s32 0, %v78_v20  ;;  %v83_v23 = vsub.s32 1, %v78_v20  ;;  %v87_v32 = vsub.s32 2, %v78_v20  ;;  %p443_p11 = scmp.lt.s32.totalorder %s305_s24, %s305_s24 }
  0x3d   :  { %v64_v17 = vpack.c.bf16 %v58_v14, %v57_v13  ;;  %v65_v18 = vpack.c.bf16 %v60_v16, %v59_v15  ;;  %v75_v22 = vld [vmem:[#allocation7] sm:$0x7]  ;;  %s438_s25 = scalar_lea.vmem %s305_s24, 3072 }
  0x3e   :  { %v541_v24 = vrot.slane %v75_v22, %v79_v21  ;;  %v543_v25 = vrot.slane %v75_v22, %v83_v23  ;;  %v88_v43 = vrot.slane %v75_v22, %v87_v32  ;;  %p439_p10 = scmp.ne.s32.totalorder %s305_s24, %s438_s25  ;;  %p444_p12 = scmp.lt.s32.totalorder %s438_s25, %s438_s25 }
  0x3f   :  { %140 = vmatpush1.bf16.msra.mxu0 %v369_v4  ;;  %352 = vmatpush1.bf16.msra.mxu1 %v369_v4 }
  0x40   :  { %337 = vmatprep.subr.bf16.mxu1 %v370_v9  ;;  %p445_p13 = por %p444_p12, %p443_p11 }
  0x42   :  { %323 = vmatmul.mubr.msk.bf16.vlgmr.msra.gmra.mrb[0].mxu0 %vm124_vm0, %v63_v10  ;;  %326 = vmatmul.mubr.msk.bf16.vlgmr.msra.gmra.mrb[0].mxu1 %vm124_vm0, %v66_v11  ;;  %p446_p0 = pnand %p445_p13, %p439_p10 }
  0x43   :  { %338 = vmatpush3.bf16.msra.mxu1 %v370_v9  ;;  %179 = vmatprep.mubr.bf16.mxu0 %v473_v0 }
  0x44   :  { %339 = vmatprep.subr.bf16.mxu1 %v371_v12  ;;  %341 = vmatprep.mubr.msk.bf16.mxu1 %vm124_vm0, %v63_v10 }
  0x47   :  { %340 = vmatpush3.bf16.msra.mxu1 %v371_v12 }
  0x4a   :  { %324 = vmatmul.mubr.msk.bf16.gmra.mrb[4].mxu0 %vm124_vm0, %v64_v17  ;;  %342 = vmatmul.mubr.msk.bf16.vlgmr.msra.gmra.mrb[4].mxu1 %vm124_vm0, %v64_v17 }
  0x4b   :  { %189 = vmatprep.mubr.bf16.mxu0 %v473_v0  ;;  %345 = vmatprep.mubr.msk.bf16.mxu1 %vm124_vm0, %v65_v18 }
  0x52   :  { %325 = vmatmul.mubr.msk.bf16.gmra.mrb[8].mxu0 %vm124_vm0, %v65_v18  ;;  %346 = vmatmul.mubr.msk.bf16.gmra.mrb[8].mxu1 %vm124_vm0, %v66_v11 }
 0x115   :  { %v171_v26 = vpop.f32.mrb[0].mxu0  ;;  %v201_v27 = vpop.f32.mrb[0].mxu1 }
 0x116   :  { %v172_v28 = vadd.f32 %v171_v26, %v541_v24  ;;  %v202_v29 = vadd.f32 %v201_v27, %v541_v24  ;;  %v173_v30 = vpop.f32.mrb[1].mxu0  ;;  %v203_v31 = vpop.f32.mrb[1].mxu1 }
 0x117   :  { %v174_v33 = vadd.f32 %v173_v30, %v543_v25  ;;  %v204_v34 = vadd.f32 %v203_v31, %v543_v25  ;;  %v175_v35 = vpop.f32.mrb[2].mxu0  ;;  %v205_v36 = vpop.f32.mrb[2].mxu1 }
 0x118   :  { %275 = vst [vmem:[#allocation8] sm:$0xff] %v172_v28  ;;  %293 = vst [vmem:[#allocation8 + $0x90] sm:$0xff] %v202_v29  ;;  %v176_v37 = vadd.f32 %v175_v35, %v541_v24  ;;  %v206_v38 = vadd.f32 %v205_v36, %v541_v24  ;;  %v177_v39 = vpop.f32.mrb[3].mxu0  ;;  %v207_v40 = vpop.f32.mrb[3].mxu1 }
 0x119   :  { %276 = vst [vmem:[#allocation8 + $0x8] sm:$0xff] %v174_v33  ;;  %294 = vst [vmem:[#allocation8 + $0x98] sm:$0xff] %v204_v34  ;;  %v178_v41 = vadd.f32 %v177_v39, %v543_v25  ;;  %v208_v42 = vadd.f32 %v207_v40, %v543_v25 }
 0x11a   :  { %278 = vst [vmem:[#allocation8 + $0x18] sm:$0xff] %v176_v37  ;;  %296 = vst [vmem:[#allocation8 + $0xa8] sm:$0xff] %v206_v38 }
 0x11b   :  { %279 = vst [vmem:[#allocation8 + $0x20] sm:$0xff] %v178_v41  ;;  %297 = vst [vmem:[#allocation8 + $0xb0] sm:$0xff] %v208_v42 }
 0x11d   :  { %v181_v44 = vpop.f32.mrb[4].mxu0  ;;  %v343_v45 = vpop.f32.mrb[4].mxu1 }
 0x11e   :  { %v182_v46 = vadd.f32 %v181_v44, %v541_v24  ;;  %v253_v47 = vadd.f32 %v343_v45, %v88_v43  ;;  %v183_v48 = vpop.f32.mrb[5].mxu0  ;;  %v244_v49 = vpop.f32.mrb[5].mxu1 }
 0x11f   :  { %v184_v50 = vadd.f32 %v183_v48, %v543_v25  ;;  %v245_v51 = vadd.f32 %v244_v49, %v88_v43  ;;  %v185_v52 = vpop.f32.mrb[6].mxu0  ;;  %v344_v53 = vpop.f32.mrb[6].mxu1 }
 0x120   :  { %281 = vst [vmem:[#allocation8 + $0x30] sm:$0xff] %v182_v46  ;;  %283 = vst [vmem:[#allocation8 + $0x40] sm:$0xff] %v253_v47  ;;  %v186_v54 = vadd.f32 %v185_v52, %v541_v24  ;;  %v256_v55 = vadd.f32 %v344_v53, %v88_v43  ;;  %v187_v56 = vpop.f32.mrb[7].mxu0  ;;  %v247_v57 = vpop.f32.mrb[7].mxu1 }
 0x121   :  { %282 = vst [vmem:[#allocation8 + $0x38] sm:$0xff] %v184_v50  ;;  %277 = vst [vmem:[#allocation8 + $0x10] sm:$0xff] %v245_v51  ;;  %v188_v58 = vadd.f32 %v187_v56, %v543_v25  ;;  %v248_v59 = vadd.f32 %v247_v57, %v88_v43 }
 0x122   :  { %284 = vst [vmem:[#allocation8 + $0x48] sm:$0xff] %v186_v54  ;;  %286 = vst [vmem:[#allocation8 + $0x58] sm:$0xff] %v256_v55 }
 0x123   :  { %285 = vst [vmem:[#allocation8 + $0x50] sm:$0xff] %v188_v58  ;;  %280 = vst [vmem:[#allocation8 + $0x28] sm:$0xff] %v248_v59 }
 0x125   :  { %v191_v60 = vpop.f32.mrb[8].mxu0  ;;  %v347_v61 = vpop.f32.mrb[8].mxu1 }
 0x126   :  { %v192_v62 = vadd.f32 %v191_v60, %v541_v24  ;;  %v269_v63 = vadd.f32 %v347_v61, %v88_v43  ;;  %v193_v0 = vpop.f32.mrb[9].mxu0  ;;  %v260_v1 = vpop.f32.mrb[9].mxu1 }
 0x127   :  { %v194_v2 = vadd.f32 %v193_v0, %v543_v25  ;;  %v261_v3 = vadd.f32 %v260_v1, %v88_v43  ;;  %v195_v4 = vpop.f32.mrb[10].mxu0  ;;  %v348_v5 = vpop.f32.mrb[10].mxu1 }
 0x128   :  { %287 = vst [vmem:[#allocation8 + $0x60] sm:$0xff] %v192_v62  ;;  %295 = vst [vmem:[#allocation8 + $0xa0] sm:$0xff] %v269_v63  ;;  %v196_v6 = vadd.f32 %v195_v4, %v541_v24  ;;  %v272_v7 = vadd.f32 %v348_v5, %v88_v43  ;;  %v197_v8 = vpop.f32.mrb[11].mxu0  ;;  %v263_v9 = vpop.f32.mrb[11].mxu1 }
 0x129   :  { %288 = vst [vmem:[#allocation8 + $0x68] sm:$0xff] %v194_v2  ;;  %289 = vst [vmem:[#allocation8 + $0x70] sm:$0xff] %v261_v3  ;;  %v198_v10 = vadd.f32 %v197_v8, %v543_v25  ;;  %v264_v11 = vadd.f32 %v263_v9, %v88_v43 }
 0x12a   :  { %290 = vst [vmem:[#allocation8 + $0x78] sm:$0xff] %v196_v6  ;;  %298 = vst [vmem:[#allocation8 + $0xb8] sm:$0xff] %v272_v7 }
 0x12b   :  { %291 = vst [vmem:[#allocation8 + $0x80] sm:$0xff] %v198_v10  ;;  %292 = vst [vmem:[#allocation8 + $0x88] sm:$0xff] %v264_v11 }
 0x12c   :  { %449 = shalt.err (!%p446_p0)
}
 0x12d   :  { %s450_s28 = scalar_lea.hbm %s576_s3, 3072 }
 0x12e   :  { %p451_p1 = scmp.ne.s32.totalorder %s576_s3, %s450_s28  ;;  %p454_p2 = scmp.lt.u32.totalorder %s450_s28, %s576_s3 }
 0x130   :  { %p456_p3 = pnand %p454_p2, %p451_p1 }
 0x132   :  { %459 = shalt.err (!%p456_p3)
}
 0x133   :  { %s475_s6 = smov 384   ;;  %s476_s7 = smov 24  }
 0x134   :  { %310 = dma.vmem_to_hbm [thread:$0]  %s305_s24, 3072, %s576_s3, [#allocation4], %s475_s6, %s475_s6, %s476_s7  }
 0x135   :  { %464 = dma.done.wait [#allocation4], 3072  }
 0x136   :  { %465 = vsyncadd [#allocation4], 4294964224 }
 0x137   :  { %314 = vsyncpa [#allocation3], 1 }
 0x138   :  { %315 = vsyncpa [#allocation6], 1 }
 0x139   :  { %316 = vsyncpa [#allocation4], 1 }

</bundles_post_ra>
